<compile_context>
chip_gen: v5e
topology: v5e:2x2
jax: 0.10.0
libtpu: 0.0.40
codegen_flags: <defaults>
</compile_context>

<pallas_src>
import math

import jax
import jax.numpy as jnp
from jax import lax
from jax.experimental import pallas as pl
from jax.experimental.pallas import tpu as pltpu

B, S, D = 2, 8, 32          # batch, sequence length, model size
H = 4                        # attention heads
DK = D // H                  # per-head dim
DFF = 64                     # feed-forward hidden size
N = B * S                    # flattened token count
EPS = 1e-6                   # LayerNorm eps (annotated-transformer default)
NEG_INF = -1e9
WLANES = 3 * D               # lane width of the packed parameter slabs


def _layernorm(x, gamma, beta):
    # Annotated-transformer LayerNorm: a_2*(x-mean)/(std+eps)+b_2, unbiased std.
    mean = jnp.mean(x, axis=-1, keepdims=True)
    var = jnp.sum((x - mean) ** 2, axis=-1, keepdims=True) * (1.0 / (x.shape[-1] - 1))
    std = jnp.sqrt(var)
    return gamma * (x - mean) / (std + EPS) + beta


def encoder_layer_kernel(x_ref, bias_ref, w_ref, b_ref, o_ref):
    x = x_ref[...]              # (N, D) flattened tokens
    mask_bias = bias_ref[...]   # (N, N) additive bias: 0 = attend, -1e9 = masked

    # ---- unpack packed parameter slabs (static sublane/lane slices) -------
    wqkv = w_ref[0:D, :]                        # (D, 3D)
    wo   = w_ref[D:2 * D, 0:D]                  # (D, D)
    w1   = w_ref[2 * D:3 * D, 0:DFF]            # (D, DFF)
    w2   = w_ref[3 * D:3 * D + DFF, 0:D]        # (DFF, D)

    b = b_ref[...]                              # (8, 3D)
    bqkv = b[0:1, :]                            # (1, 3D)
    bf1  = b[1:2, 0:DFF]
    bo   = b[2:3, 0:D]
    g1   = b[3:4, 0:D]
    be1  = b[4:5, 0:D]
    bf2  = b[5:6, 0:D]
    g2   = b[6:7, 0:D]
    be2  = b[7:8, 0:D]

    # ---------------- sublayer 0: x + MHA(LN(x)) ---------------------------
    xn = _layernorm(x, g1, be1)
    qkv = jnp.dot(xn, wqkv, preferred_element_type=jnp.float32) + bqkv   # (N, 3D)

    scale = 1.0 / math.sqrt(DK)
    attn = jnp.zeros((N, D), jnp.float32)
    for h in range(H):                          # static loop, H small
        lo = h * DK
        qh = qkv[:, lo:lo + DK]                 # (N, DK)
        kh = qkv[:, D + lo:D + lo + DK]
        vh = qkv[:, 2 * D + lo:2 * D + lo + DK]
        # q @ k^T via dot_general contracting last axes (no materialized kh.T)
        s = lax.dot_general(qh, kh, (((1,), (1,)), ((), ())),
                            preferred_element_type=jnp.float32) * scale
        s = s + mask_bias                       # key mask + cross-batch block mask
        s = s - jnp.max(s, axis=-1, keepdims=True)
        p = jnp.exp(s)
        p = p * pl.reciprocal(jnp.sum(p, axis=-1, keepdims=True), approx=True)
        hv = jnp.dot(p, vh, preferred_element_type=jnp.float32)          # (N, DK)
        # fold output projection into the head loop (wo row slice = sublane slice)
        attn = attn + jnp.dot(hv, wo[lo:lo + DK, :],
                              preferred_element_type=jnp.float32)
    x1 = x + attn + bo                          # dropout == identity

    # ---------------- sublayer 1: x + FFN(LN(x)) ---------------------------
    x1n = _layernorm(x1, g2, be2)
    h1 = jnp.maximum(jnp.dot(x1n, w1, preferred_element_type=jnp.float32) + bf1, 0.0)
    h2 = jnp.dot(h1, w2, preferred_element_type=jnp.float32) + bf2
    o_ref[...] = x1 + h2                        # dropout == identity
    # TODO(synk): dropout (train mode) has no in-kernel equivalent here; the
    # module's forward with p=0 / eval is the identity, which is what we compute.


def _pad2(a, rows, cols):
    return jnp.pad(a, ((0, rows - a.shape[0]), (0, cols - a.shape[1])))


def encoder_layer(x, mask, params):
    """x: (B,S,D) f32, mask: (B,1,S) int32 (1 = attend, 0 = masked key)."""
    # ---- pack weights: one (3D+DFF, 3D) slab + one (8, 3D) vector slab ----
    wqkv = jnp.concatenate([params["wq"], params["wk"], params["wv"]], axis=1)
    wslab = jnp.concatenate([
        _pad2(wqkv, D, WLANES),
        _pad2(params["wo"], D, WLANES),
        _pad2(params["w1"], D, WLANES),
        _pad2(params["w2"], DFF, WLANES),
    ], axis=0)                                                  # (160, 96)

    bqkv = jnp.concatenate([params["bq"], params["bk"], params["bv"]], axis=1)
    brows = [bqkv, params["bf1"], params["bo"], params["g1"], params["be1"],
             params["bf2"], params["g2"], params["be2"]]
    bslab = jnp.concatenate([_pad2(r, 1, WLANES) for r in brows], axis=0)  # (8, 96)

    # ---- additive attention-mask bias over flattened tokens ---------------
    # bias[i, j] = 0 if token j is an attendable key in the SAME batch as i,
    # else -1e9 (covers both the key mask and the cross-batch block mask).
    batch_idx = jnp.repeat(jnp.arange(B), S)                    # (N,)
    same_batch = batch_idx[:, None] == batch_idx[None, :]
    key_ok = (mask[:, 0, :].reshape(N) != 0)[None, :]
    mask_bias = jnp.where(same_batch & key_ok, 0.0, NEG_INF).astype(jnp.float32)

    x_flat = x.reshape(N, D)
    vmem = pl.BlockSpec(memory_space=pltpu.MemorySpace.VMEM)
    out_flat = pl.pallas_call(
        encoder_layer_kernel,
        out_shape=jax.ShapeDtypeStruct((N, D), jnp.float32),
        in_specs=[vmem, vmem, vmem, vmem],
        out_specs=vmem,
    )(x_flat, mask_bias, wslab, bslab)
    return out_flat.reshape(B, S, D)


def init_params(key):
    """Deterministic synthetic parameters (PyTorch (out,in) shapes, transposed
    so the kernel computes y = x @ W + b)."""
    ks = jax.random.split(key, 12)
    s = 0.1

    def lin(k, out_dim, in_dim):
        w = s * jax.random.normal(k, (out_dim, in_dim), jnp.float32)  # torch (out,in)
        return w.T                                                    # kernel (in,out)

    return {
        "wq": lin(ks[0], D, D),  "bq": jnp.zeros((1, D), jnp.float32),
        "wk": lin(ks[1], D, D),  "bk": jnp.zeros((1, D), jnp.float32),
        "wv": lin(ks[2], D, D),  "bv": jnp.zeros((1, D), jnp.float32),
        "wo": lin(ks[3], D, D),  "bo": jnp.zeros((1, D), jnp.float32),
        "g1": jnp.ones((1, D), jnp.float32), "be1": jnp.zeros((1, D), jnp.float32),
        "w1": lin(ks[4], DFF, D), "bf1": jnp.zeros((1, DFF), jnp.float32),
        "w2": lin(ks[5], D, DFF), "bf2": jnp.zeros((1, D), jnp.float32),
        "g2": jnp.ones((1, D), jnp.float32), "be2": jnp.zeros((1, D), jnp.float32),
    }


def encoder_layer_ref(x, mask, params):
    """Pure-JAX reference (mirrors the annotated-transformer math)."""
    def ln(t, g, b_):
        mean = jnp.mean(t, -1, keepdims=True)
        var = jnp.sum((t - mean) ** 2, -1, keepdims=True) / (t.shape[-1] - 1)
        return g * (t - mean) / (jnp.sqrt(var) + EPS) + b_

    xn = ln(x, params["g1"], params["be1"])
    q = xn @ params["wq"] + params["bq"]
    k = xn @ params["wk"] + params["bk"]
    v = xn @ params["wv"] + params["bv"]
    split = lambda t: t.reshape(B, S, H, DK).transpose(0, 2, 1, 3)
    qh, kh, vh = split(q), split(k), split(v)
    scores = jnp.einsum("bhqd,bhkd->bhqk", qh, kh) / math.sqrt(DK)
    scores = jnp.where(mask[:, None, :, :] == 0, NEG_INF, scores)
    p = jax.nn.softmax(scores, axis=-1)
    attn = jnp.einsum("bhqk,bhkd->bhqd", p, vh).transpose(0, 2, 1, 3).reshape(B, S, D)
    x1 = x + attn @ params["wo"] + params["bo"]
    x1n = ln(x1, params["g2"], params["be2"])
    h1 = jnp.maximum(x1n @ params["w1"] + params["bf1"], 0.0)
    return x1 + h1 @ params["w2"] + params["bf2"]


if __name__ == "__main__":
    key = jax.random.PRNGKey(0)
    kx, kp = jax.random.split(key)
    x = jax.random.normal(kx, (B, S, D), jnp.float32)
    # mask: [B,1,S]; 1 = attend, 0 = masked key. Mask the last 2 keys of batch 1.
    mask = jnp.ones((B, 1, S), jnp.int32).at[1, 0, S - 2:].set(0)
    params = init_params(kp)

    out = encoder_layer(x, mask, params)
    jax.block_until_ready(out)
    assert out.shape == (B, S, D)
    assert bool(jnp.all(jnp.isfinite(out)))

    ref = encoder_layer_ref(x, mask, params)
    err = float(jnp.max(jnp.abs(out - ref)))
    assert err < 5e-2, f"mismatch vs reference: max abs err = {err}"
    print("KERNEL_OK")
</pallas_src>

<mosaic_0001>
module attributes {stable_mosaic.version = 11 : i64} {
  func.func @encoder_layer_kernel(%arg0: memref<16x32xf32, #tpu.memory_space<vmem>>, %arg1: memref<16x16xf32, #tpu.memory_space<vmem>>, %arg2: memref<160x96xf32, #tpu.memory_space<vmem>>, %arg3: memref<8x96xf32, #tpu.memory_space<vmem>>, %arg4: memref<16x32xf32, #tpu.memory_space<vmem>>) attributes {dimension_semantics = [], scalar_prefetch = 0 : i64, scratch_operands = 0 : i64, tpu.core_type = #tpu.core_type<tc>} {
    %c0 = arith.constant 0 : index
    %c0_0 = arith.constant 0 : index
    %0 = vector.load %arg0[%c0, %c0_0] : memref<16x32xf32, #tpu.memory_space<vmem>>, vector<16x32xf32>
    %c0_1 = arith.constant 0 : index
    %c0_2 = arith.constant 0 : index
    %1 = vector.load %arg1[%c0_1, %c0_2] : memref<16x16xf32, #tpu.memory_space<vmem>>, vector<16x16xf32>
    %c0_3 = arith.constant 0 : index
    %c0_4 = arith.constant 0 : index
    %2 = vector.load %arg2[%c0_3, %c0_4] : memref<160x96xf32, #tpu.memory_space<vmem>>, vector<32x96xf32>
    %c32 = arith.constant 32 : index
    %c0_5 = arith.constant 0 : index
    %3 = vector.load %arg2[%c32, %c0_5] : memref<160x96xf32, #tpu.memory_space<vmem>>, vector<32x32xf32>
    %c64 = arith.constant 64 : index
    %c0_6 = arith.constant 0 : index
    %4 = vector.load %arg2[%c64, %c0_6] : memref<160x96xf32, #tpu.memory_space<vmem>>, vector<32x64xf32>
    %c96 = arith.constant 96 : index
    %c0_7 = arith.constant 0 : index
    %5 = vector.load %arg2[%c96, %c0_7] : memref<160x96xf32, #tpu.memory_space<vmem>>, vector<64x32xf32>
    %c0_8 = arith.constant 0 : index
    %c0_9 = arith.constant 0 : index
    %6 = vector.load %arg3[%c0_8, %c0_9] : memref<8x96xf32, #tpu.memory_space<vmem>>, vector<8x96xf32>
    %7 = vector.extract_strided_slice %6 {offsets = [0, 0], sizes = [1, 96], strides = [1, 1]} : vector<8x96xf32> to vector<1x96xf32>
    %8 = vector.extract_strided_slice %6 {offsets = [1, 0], sizes = [1, 64], strides = [1, 1]} : vector<8x96xf32> to vector<1x64xf32>
    %9 = vector.extract_strided_slice %6 {offsets = [2, 0], sizes = [1, 32], strides = [1, 1]} : vector<8x96xf32> to vector<1x32xf32>
    %10 = vector.extract_strided_slice %6 {offsets = [3, 0], sizes = [1, 32], strides = [1, 1]} : vector<8x96xf32> to vector<1x32xf32>
    %11 = vector.extract_strided_slice %6 {offsets = [4, 0], sizes = [1, 32], strides = [1, 1]} : vector<8x96xf32> to vector<1x32xf32>
    %12 = vector.extract_strided_slice %6 {offsets = [5, 0], sizes = [1, 32], strides = [1, 1]} : vector<8x96xf32> to vector<1x32xf32>
    %13 = vector.extract_strided_slice %6 {offsets = [6, 0], sizes = [1, 32], strides = [1, 1]} : vector<8x96xf32> to vector<1x32xf32>
    %14 = vector.extract_strided_slice %6 {offsets = [7, 0], sizes = [1, 32], strides = [1, 1]} : vector<8x96xf32> to vector<1x32xf32>
    %cst = arith.constant dense<0.000000e+00> : vector<16xf32>
    %15 = vector.multi_reduction <add>, %0, %cst [1] : vector<16x32xf32> to vector<16xf32>
    %16 = vector.shape_cast %15 : vector<16xf32> to vector<16x1xf32>
    %cst_10 = arith.constant 3.200000e+01 : f32
    %17 = vector.broadcast %cst_10 : f32 to vector<16x1xf32>
    %18 = arith.divf %16, %17 : vector<16x1xf32>
    %19 = vector.broadcast %18 : vector<16x1xf32> to vector<16x32xf32>
    %20 = arith.subf %0, %19 : vector<16x32xf32>
    %21 = arith.mulf %20, %20 : vector<16x32xf32>
    %cst_11 = arith.constant dense<0.000000e+00> : vector<16xf32>
    %22 = vector.multi_reduction <add>, %21, %cst_11 [1] : vector<16x32xf32> to vector<16xf32>
    %23 = vector.shape_cast %22 : vector<16xf32> to vector<16x1xf32>
    %cst_12 = arith.constant 0.0322580636 : f32
    %24 = vector.broadcast %cst_12 : f32 to vector<16x1xf32>
    %25 = arith.mulf %23, %24 : vector<16x1xf32>
    %26 = math.sqrt %25 : vector<16x1xf32>
    %27 = vector.broadcast %18 : vector<16x1xf32> to vector<16x32xf32>
    %28 = arith.subf %0, %27 : vector<16x32xf32>
    %29 = vector.broadcast %10 : vector<1x32xf32> to vector<16x32xf32>
    %30 = arith.mulf %29, %28 : vector<16x32xf32>
    %cst_13 = arith.constant 9.99999997E-7 : f32
    %31 = vector.broadcast %cst_13 : f32 to vector<16x1xf32>
    %32 = arith.addf %26, %31 : vector<16x1xf32>
    %33 = vector.broadcast %32 : vector<16x1xf32> to vector<16x32xf32>
    %34 = arith.divf %30, %33 : vector<16x32xf32>
    %35 = vector.broadcast %11 : vector<1x32xf32> to vector<16x32xf32>
    %36 = arith.addf %34, %35 : vector<16x32xf32>
    %cst_14 = arith.constant dense<0.000000e+00> : vector<16x96xf32>
    %37 = tpu.matmul %36, %2, %cst_14 {dimension_numbers = #tpu.dot_dimension_numbers<[1], [0], [0], [1], [0, 0, 1, 1], [], []>} : vector<16x32xf32>, vector<32x96xf32>, vector<16x96xf32> -> vector<16x96xf32>
    %38 = vector.broadcast %7 : vector<1x96xf32> to vector<16x96xf32>
    %39 = arith.addf %37, %38 : vector<16x96xf32>
    %cst_15 = arith.constant 0.000000e+00 : f32
    %40 = vector.broadcast %cst_15 : f32 to vector<16x32xf32>
    %41 = vector.extract_strided_slice %39 {offsets = [0, 0], sizes = [16, 8], strides = [1, 1]} : vector<16x96xf32> to vector<16x8xf32>
    %42 = vector.extract_strided_slice %39 {offsets = [0, 32], sizes = [16, 8], strides = [1, 1]} : vector<16x96xf32> to vector<16x8xf32>
    %43 = vector.extract_strided_slice %39 {offsets = [0, 64], sizes = [16, 8], strides = [1, 1]} : vector<16x96xf32> to vector<16x8xf32>
    %cst_16 = arith.constant dense<0.000000e+00> : vector<16x16xf32>
    %44 = tpu.matmul %41, %42, %cst_16 {dimension_numbers = #tpu.dot_dimension_numbers<[1], [1], [0], [0], [0, 0, 1, 0], [], []>} : vector<16x8xf32>, vector<16x8xf32>, vector<16x16xf32> -> vector<16x16xf32>
    %cst_17 = arith.constant 0.353553385 : f32
    %45 = vector.broadcast %cst_17 : f32 to vector<16x16xf32>
    %46 = arith.mulf %44, %45 : vector<16x16xf32>
    %47 = arith.addf %46, %1 : vector<16x16xf32>
    %cst_18 = arith.constant dense<0xFF800000> : vector<16xf32>
    %48 = vector.multi_reduction <maximumf>, %47, %cst_18 [1] : vector<16x16xf32> to vector<16xf32>
    %49 = vector.shape_cast %48 : vector<16xf32> to vector<16x1xf32>
    %50 = vector.broadcast %49 : vector<16x1xf32> to vector<16x16xf32>
    %51 = arith.subf %47, %50 : vector<16x16xf32>
    %52 = math.exp %51 : vector<16x16xf32>
    %cst_19 = arith.constant dense<0.000000e+00> : vector<16xf32>
    %53 = vector.multi_reduction <add>, %52, %cst_19 [1] : vector<16x16xf32> to vector<16xf32>
    %54 = vector.shape_cast %53 : vector<16xf32> to vector<16x1xf32>
    %55 = tpu.reciprocal %54 {approx = true} : vector<16x1xf32> -> vector<16x1xf32>
    %56 = vector.broadcast %55 : vector<16x1xf32> to vector<16x16xf32>
    %57 = arith.mulf %52, %56 : vector<16x16xf32>
    %cst_20 = arith.constant dense<0.000000e+00> : vector<16x8xf32>
    %58 = tpu.matmul %57, %43, %cst_20 {dimension_numbers = #tpu.dot_dimension_numbers<[1], [0], [0], [1], [0, 0, 1, 1], [], []>} : vector<16x16xf32>, vector<16x8xf32>, vector<16x8xf32> -> vector<16x8xf32>
    %59 = vector.extract_strided_slice %3 {offsets = [0, 0], sizes = [8, 32], strides = [1, 1]} : vector<32x32xf32> to vector<8x32xf32>
    %cst_21 = arith.constant dense<0.000000e+00> : vector<16x32xf32>
    %60 = tpu.matmul %58, %59, %cst_21 {dimension_numbers = #tpu.dot_dimension_numbers<[1], [0], [0], [1], [0, 0, 1, 1], [], []>} : vector<16x8xf32>, vector<8x32xf32>, vector<16x32xf32> -> vector<16x32xf32>
    %61 = arith.addf %40, %60 : vector<16x32xf32>
    %62 = vector.extract_strided_slice %39 {offsets = [0, 8], sizes = [16, 8], strides = [1, 1]} : vector<16x96xf32> to vector<16x8xf32>
    %63 = vector.extract_strided_slice %39 {offsets = [0, 40], sizes = [16, 8], strides = [1, 1]} : vector<16x96xf32> to vector<16x8xf32>
    %64 = vector.extract_strided_slice %39 {offsets = [0, 72], sizes = [16, 8], strides = [1, 1]} : vector<16x96xf32> to vector<16x8xf32>
    %cst_22 = arith.constant dense<0.000000e+00> : vector<16x16xf32>
    %65 = tpu.matmul %62, %63, %cst_22 {dimension_numbers = #tpu.dot_dimension_numbers<[1], [1], [0], [0], [0, 0, 1, 0], [], []>} : vector<16x8xf32>, vector<16x8xf32>, vector<16x16xf32> -> vector<16x16xf32>
    %cst_23 = arith.constant 0.353553385 : f32
    %66 = vector.broadcast %cst_23 : f32 to vector<16x16xf32>
    %67 = arith.mulf %65, %66 : vector<16x16xf32>
    %68 = arith.addf %67, %1 : vector<16x16xf32>
    %cst_24 = arith.constant dense<0xFF800000> : vector<16xf32>
    %69 = vector.multi_reduction <maximumf>, %68, %cst_24 [1] : vector<16x16xf32> to vector<16xf32>
    %70 = vector.shape_cast %69 : vector<16xf32> to vector<16x1xf32>
    %71 = vector.broadcast %70 : vector<16x1xf32> to vector<16x16xf32>
    %72 = arith.subf %68, %71 : vector<16x16xf32>
    %73 = math.exp %72 : vector<16x16xf32>
    %cst_25 = arith.constant dense<0.000000e+00> : vector<16xf32>
    %74 = vector.multi_reduction <add>, %73, %cst_25 [1] : vector<16x16xf32> to vector<16xf32>
    %75 = vector.shape_cast %74 : vector<16xf32> to vector<16x1xf32>
    %76 = tpu.reciprocal %75 {approx = true} : vector<16x1xf32> -> vector<16x1xf32>
    %77 = vector.broadcast %76 : vector<16x1xf32> to vector<16x16xf32>
    %78 = arith.mulf %73, %77 : vector<16x16xf32>
    %cst_26 = arith.constant dense<0.000000e+00> : vector<16x8xf32>
    %79 = tpu.matmul %78, %64, %cst_26 {dimension_numbers = #tpu.dot_dimension_numbers<[1], [0], [0], [1], [0, 0, 1, 1], [], []>} : vector<16x16xf32>, vector<16x8xf32>, vector<16x8xf32> -> vector<16x8xf32>
    %80 = vector.extract_strided_slice %3 {offsets = [8, 0], sizes = [8, 32], strides = [1, 1]} : vector<32x32xf32> to vector<8x32xf32>
    %cst_27 = arith.constant dense<0.000000e+00> : vector<16x32xf32>
    %81 = tpu.matmul %79, %80, %cst_27 {dimension_numbers = #tpu.dot_dimension_numbers<[1], [0], [0], [1], [0, 0, 1, 1], [], []>} : vector<16x8xf32>, vector<8x32xf32>, vector<16x32xf32> -> vector<16x32xf32>
    %82 = arith.addf %61, %81 : vector<16x32xf32>
    %83 = vector.extract_strided_slice %39 {offsets = [0, 16], sizes = [16, 8], strides = [1, 1]} : vector<16x96xf32> to vector<16x8xf32>
    %84 = vector.extract_strided_slice %39 {offsets = [0, 48], sizes = [16, 8], strides = [1, 1]} : vector<16x96xf32> to vector<16x8xf32>
    %85 = vector.extract_strided_slice %39 {offsets = [0, 80], sizes = [16, 8], strides = [1, 1]} : vector<16x96xf32> to vector<16x8xf32>
    %cst_28 = arith.constant dense<0.000000e+00> : vector<16x16xf32>
    %86 = tpu.matmul %83, %84, %cst_28 {dimension_numbers = #tpu.dot_dimension_numbers<[1], [1], [0], [0], [0, 0, 1, 0], [], []>} : vector<16x8xf32>, vector<16x8xf32>, vector<16x16xf32> -> vector<16x16xf32>
    %cst_29 = arith.constant 0.353553385 : f32
    %87 = vector.broadcast %cst_29 : f32 to vector<16x16xf32>
    %88 = arith.mulf %86, %87 : vector<16x16xf32>
    %89 = arith.addf %88, %1 : vector<16x16xf32>
    %cst_30 = arith.constant dense<0xFF800000> : vector<16xf32>
    %90 = vector.multi_reduction <maximumf>, %89, %cst_30 [1] : vector<16x16xf32> to vector<16xf32>
    %91 = vector.shape_cast %90 : vector<16xf32> to vector<16x1xf32>
    %92 = vector.broadcast %91 : vector<16x1xf32> to vector<16x16xf32>
    %93 = arith.subf %89, %92 : vector<16x16xf32>
    %94 = math.exp %93 : vector<16x16xf32>
    %cst_31 = arith.constant dense<0.000000e+00> : vector<16xf32>
    %95 = vector.multi_reduction <add>, %94, %cst_31 [1] : vector<16x16xf32> to vector<16xf32>
    %96 = vector.shape_cast %95 : vector<16xf32> to vector<16x1xf32>
    %97 = tpu.reciprocal %96 {approx = true} : vector<16x1xf32> -> vector<16x1xf32>
    %98 = vector.broadcast %97 : vector<16x1xf32> to vector<16x16xf32>
    %99 = arith.mulf %94, %98 : vector<16x16xf32>
    %cst_32 = arith.constant dense<0.000000e+00> : vector<16x8xf32>
    %100 = tpu.matmul %99, %85, %cst_32 {dimension_numbers = #tpu.dot_dimension_numbers<[1], [0], [0], [1], [0, 0, 1, 1], [], []>} : vector<16x16xf32>, vector<16x8xf32>, vector<16x8xf32> -> vector<16x8xf32>
    %101 = vector.extract_strided_slice %3 {offsets = [16, 0], sizes = [8, 32], strides = [1, 1]} : vector<32x32xf32> to vector<8x32xf32>
    %cst_33 = arith.constant dense<0.000000e+00> : vector<16x32xf32>
    %102 = tpu.matmul %100, %101, %cst_33 {dimension_numbers = #tpu.dot_dimension_numbers<[1], [0], [0], [1], [0, 0, 1, 1], [], []>} : vector<16x8xf32>, vector<8x32xf32>, vector<16x32xf32> -> vector<16x32xf32>
    %103 = arith.addf %82, %102 : vector<16x32xf32>
    %104 = vector.extract_strided_slice %39 {offsets = [0, 24], sizes = [16, 8], strides = [1, 1]} : vector<16x96xf32> to vector<16x8xf32>
    %105 = vector.extract_strided_slice %39 {offsets = [0, 56], sizes = [16, 8], strides = [1, 1]} : vector<16x96xf32> to vector<16x8xf32>
    %106 = vector.extract_strided_slice %39 {offsets = [0, 88], sizes = [16, 8], strides = [1, 1]} : vector<16x96xf32> to vector<16x8xf32>
    %cst_34 = arith.constant dense<0.000000e+00> : vector<16x16xf32>
    %107 = tpu.matmul %104, %105, %cst_34 {dimension_numbers = #tpu.dot_dimension_numbers<[1], [1], [0], [0], [0, 0, 1, 0], [], []>} : vector<16x8xf32>, vector<16x8xf32>, vector<16x16xf32> -> vector<16x16xf32>
    %cst_35 = arith.constant 0.353553385 : f32
    %108 = vector.broadcast %cst_35 : f32 to vector<16x16xf32>
    %109 = arith.mulf %107, %108 : vector<16x16xf32>
    %110 = arith.addf %109, %1 : vector<16x16xf32>
    %cst_36 = arith.constant dense<0xFF800000> : vector<16xf32>
    %111 = vector.multi_reduction <maximumf>, %110, %cst_36 [1] : vector<16x16xf32> to vector<16xf32>
    %112 = vector.shape_cast %111 : vector<16xf32> to vector<16x1xf32>
    %113 = vector.broadcast %112 : vector<16x1xf32> to vector<16x16xf32>
    %114 = arith.subf %110, %113 : vector<16x16xf32>
    %115 = math.exp %114 : vector<16x16xf32>
    %cst_37 = arith.constant dense<0.000000e+00> : vector<16xf32>
    %116 = vector.multi_reduction <add>, %115, %cst_37 [1] : vector<16x16xf32> to vector<16xf32>
    %117 = vector.shape_cast %116 : vector<16xf32> to vector<16x1xf32>
    %118 = tpu.reciprocal %117 {approx = true} : vector<16x1xf32> -> vector<16x1xf32>
    %119 = vector.broadcast %118 : vector<16x1xf32> to vector<16x16xf32>
    %120 = arith.mulf %115, %119 : vector<16x16xf32>
    %cst_38 = arith.constant dense<0.000000e+00> : vector<16x8xf32>
    %121 = tpu.matmul %120, %106, %cst_38 {dimension_numbers = #tpu.dot_dimension_numbers<[1], [0], [0], [1], [0, 0, 1, 1], [], []>} : vector<16x16xf32>, vector<16x8xf32>, vector<16x8xf32> -> vector<16x8xf32>
    %122 = vector.extract_strided_slice %3 {offsets = [24, 0], sizes = [8, 32], strides = [1, 1]} : vector<32x32xf32> to vector<8x32xf32>
    %cst_39 = arith.constant dense<0.000000e+00> : vector<16x32xf32>
    %123 = tpu.matmul %121, %122, %cst_39 {dimension_numbers = #tpu.dot_dimension_numbers<[1], [0], [0], [1], [0, 0, 1, 1], [], []>} : vector<16x8xf32>, vector<8x32xf32>, vector<16x32xf32> -> vector<16x32xf32>
    %124 = arith.addf %103, %123 : vector<16x32xf32>
    %125 = arith.addf %0, %124 : vector<16x32xf32>
    %126 = vector.broadcast %9 : vector<1x32xf32> to vector<16x32xf32>
    %127 = arith.addf %125, %126 : vector<16x32xf32>
    %cst_40 = arith.constant dense<0.000000e+00> : vector<16xf32>
    %128 = vector.multi_reduction <add>, %127, %cst_40 [1] : vector<16x32xf32> to vector<16xf32>
    %129 = vector.shape_cast %128 : vector<16xf32> to vector<16x1xf32>
    %cst_41 = arith.constant 3.200000e+01 : f32
    %130 = vector.broadcast %cst_41 : f32 to vector<16x1xf32>
    %131 = arith.divf %129, %130 : vector<16x1xf32>
    %132 = vector.broadcast %131 : vector<16x1xf32> to vector<16x32xf32>
    %133 = arith.subf %127, %132 : vector<16x32xf32>
    %134 = arith.mulf %133, %133 : vector<16x32xf32>
    %cst_42 = arith.constant dense<0.000000e+00> : vector<16xf32>
    %135 = vector.multi_reduction <add>, %134, %cst_42 [1] : vector<16x32xf32> to vector<16xf32>
    %136 = vector.shape_cast %135 : vector<16xf32> to vector<16x1xf32>
    %cst_43 = arith.constant 0.0322580636 : f32
    %137 = vector.broadcast %cst_43 : f32 to vector<16x1xf32>
    %138 = arith.mulf %136, %137 : vector<16x1xf32>
    %139 = math.sqrt %138 : vector<16x1xf32>
    %140 = vector.broadcast %131 : vector<16x1xf32> to vector<16x32xf32>
    %141 = arith.subf %127, %140 : vector<16x32xf32>
    %142 = vector.broadcast %13 : vector<1x32xf32> to vector<16x32xf32>
    %143 = arith.mulf %142, %141 : vector<16x32xf32>
    %cst_44 = arith.constant 9.99999997E-7 : f32
    %144 = vector.broadcast %cst_44 : f32 to vector<16x1xf32>
    %145 = arith.addf %139, %144 : vector<16x1xf32>
    %146 = vector.broadcast %145 : vector<16x1xf32> to vector<16x32xf32>
    %147 = arith.divf %143, %146 : vector<16x32xf32>
    %148 = vector.broadcast %14 : vector<1x32xf32> to vector<16x32xf32>
    %149 = arith.addf %147, %148 : vector<16x32xf32>
    %cst_45 = arith.constant dense<0.000000e+00> : vector<16x64xf32>
    %150 = tpu.matmul %149, %4, %cst_45 {dimension_numbers = #tpu.dot_dimension_numbers<[1], [0], [0], [1], [0, 0, 1, 1], [], []>} : vector<16x32xf32>, vector<32x64xf32>, vector<16x64xf32> -> vector<16x64xf32>
    %151 = vector.broadcast %8 : vector<1x64xf32> to vector<16x64xf32>
    %152 = arith.addf %150, %151 : vector<16x64xf32>
    %cst_46 = arith.constant 0.000000e+00 : f32
    %153 = vector.broadcast %cst_46 : f32 to vector<16x64xf32>
    %154 = arith.maximumf %152, %153 : vector<16x64xf32>
    %cst_47 = arith.constant dense<0.000000e+00> : vector<16x32xf32>
    %155 = tpu.matmul %154, %5, %cst_47 {dimension_numbers = #tpu.dot_dimension_numbers<[1], [0], [0], [1], [0, 0, 1, 1], [], []>} : vector<16x64xf32>, vector<64x32xf32>, vector<16x32xf32> -> vector<16x32xf32>
    %156 = vector.broadcast %12 : vector<1x32xf32> to vector<16x32xf32>
    %157 = arith.addf %155, %156 : vector<16x32xf32>
    %158 = arith.addf %127, %157 : vector<16x32xf32>
    %c0_48 = arith.constant 0 : index
    %c0_49 = arith.constant 0 : index
    %159 = vector.load %arg4[%c0_48, %c0_49] : memref<16x32xf32, #tpu.memory_space<vmem>>, vector<16x32xf32>
    tpu.vector_store %arg4[%c0_48, %c0_49], %158 {strides = array<i32>} : memref<16x32xf32, #tpu.memory_space<vmem>>, vector<16x32xf32>,
    return
  }
}

</mosaic_0001>

<bundles_post_ra>
// kernel: tpu_custom_call.1
= control target key start
LH: loop header
LB: loop body
LE: loop exit
PB: predicated region body
PF: predicated region fallthrough
CT: control target
= control target key end

     0   :  { %9 = vsyncpa [#allocation3], 0  ;;  %s1417_s0 = inlined_call_operand.hbm [shape: f32[16,32], index: 0, kind: input, shape index: {}]   ;;  %s1418_s1 = inlined_call_operand.hbm [shape: f32[16,16], index: 1, kind: input, shape index: {}]   ;;  %s1419_s2 = inlined_call_operand.hbm [shape: f32[160,96], index: 2, kind: input, shape index: {}]   ;;  %s1420_s3 = inlined_call_operand.hbm [shape: f32[8,96], index: 3, kind: input, shape index: {}]   ;;  %s1421_s4 = inlined_call_operand.hbm [shape: f32[16,32], index: 4, kind: output, shape index: {}]  }
   0x1   :  { %10 = vsyncpa [#allocation6], 0 }
   0x2   :  { %11 = vsyncpa [#allocation9], 0 }
   0x3   :  { %12 = vsyncpa [#allocation4], 0  ;;  %s30_s17 = sshll.u32 %s1418_s1, 4  ;;  %s1178_s18 = smov [#allocation5]   ;;  %s31_s17 = int_to_ptr.hbm [resolvable:$true] %s30_s17 }
   0x4   :  { %s32_s19 = sshll.u32 %s1178_s18, 4  ;;  %s17_s22 = sshll.u32 %s1417_s0, 4  ;;  %s33_s19 = int_to_ptr.vmem [resolvable:$true] %s32_s19  ;;  %s18_s22 = int_to_ptr.hbm [resolvable:$true] %s17_s22 }
   0x5   :  { %s1179_s23 = smov 128   ;;  %s1180_s24 = smov 8  }
   0x6   :  { %38 = dma.hbm_to_vmem [thread:$0]  %s31_s17, 256, %s33_s19, [#allocation6], %s1179_s23, %s1179_s23, %s1180_s24  }
   0x7   :  { %s1181_s25 = smov [#allocation2]   ;;  %s43_s1 = sshll.u32 %s1419_s2, 4  ;;  %s44_s1 = int_to_ptr.hbm [resolvable:$true] %s43_s1 }
   0x8   :  { %s19_s26 = sshll.u32 %s1181_s25, 4  ;;  %s57_s30 = sshll.u32 %s1420_s3, 4  ;;  %s20_s26 = int_to_ptr.vmem [resolvable:$true] %s19_s26  ;;  %s58_s30 = int_to_ptr.hbm [resolvable:$true] %s57_s30 }
   0x9   :  { %25 = dma.hbm_to_vmem [thread:$0]  %s18_s22, 256, %s20_s26, [#allocation3], %s1179_s23, %s1179_s23, %s1180_s24  }
   0xa   :  { %s1182_s5 = smov [#allocation7]   ;;  %s1183_s7 = smov [#allocation8]  }
   0xb   :  { %s45_s6 = sshll.u32 %s1182_s5, 4  ;;  %s59_s2 = sshll.u32 %s1183_s7, 4  ;;  %s46_s6 = int_to_ptr.vmem [resolvable:$true] %s45_s6  ;;  %s60_s2 = int_to_ptr.vmem [resolvable:$true] %s59_s2 }
   0xc   :  { %51 = dma.hbm_to_vmem [thread:$0]  %s44_s1, 2560, %s46_s6, [#allocation6], %s1179_s23, %s1179_s23, %s1180_s24  }
   0xd   :  { %62 = dma.hbm_to_vmem [thread:$0]  %s58_s30, 128, %s60_s2, [#allocation9]  }
   0xe   :  { %1170 = dma.done.wait [#allocation3], 256  }
   0xf   :  { %1171 = vsyncadd [#allocation3], 4294967040 }
  0x10   :  { %1172 = dma.done.wait [#allocation6], 2816  }
  0x11   :  { %1173 = vsyncadd [#allocation6], 4294964480 }
  0x12   :  { %1174 = dma.done.wait [#allocation9], 128  }
  0x13   :  { %1175 = vsyncadd [#allocation9], 4294967168  ;;  %vm104_vm0 = vcmask 261120   ;;  %v1243_v0 = vld [vmem:[#allocation2 + $0x8] sm:$0xff]  ;;  %v1247_v2 = vld [vmem:[#allocation2] sm:$0xff]  ;;  %v1184_v4 = vmov 32.0  }
  0x14   :  { %v108_v1 = vsel %vm104_vm0, %v1243_v0, 0.0  ;;  %v105_v3 = vsel %vm104_vm0, %v1247_v2, 0.0  ;;  %1000 = vrcp.f32 %v1184_v4  ;;  %v86_v21 = vld [vmem:[#allocation7 + $0x18] sm:$0xff]  ;;  %v85_v22 = vld [vmem:[#allocation7 + $0x10] sm:$0xff]  ;;  %v84_v23 = vld [vmem:[#allocation7 + $0x8] sm:$0xff]  ;;  %s1185_s3 = smov 96  }
  0x15   :  { %109 = vadd.xlane.f32.xlu0 %v108_v1  ;;  %957 = vmatpush.msra.mxu3 %v86_v21  ;;  %v83_v25 = vld [vmem:[#allocation7] sm:$0xff]  ;;  %vm230_vm14 = vcmask 64512   ;;  %vm266_vm15 = vcmask 130048   ;;  %s1186_s8 = smov 64   ;;  %s1187_s9 = smov 88  }
  0x16   :  { %213 = vmatpush.msra.mxu0 %v86_v21  ;;  %v1267_v52 = vld [vmem:[#allocation8] sm:$0xff]  ;;  %s1188_s10 = smov 120   ;;  %s1189_s11 = smov 72  }
  0x17   :  { %958 = vmatpush.msra.mxu3 %v85_v22  ;;  %v156_v55 = vperm.slane %v1267_v52, 3  ;;  %v191_v1 = vperm.slane %v1267_v52, 4  ;;  %s1190_s12 = smov 104   ;;  %s1191_s13 = smov 80  }
  0x18   :  { %214 = vmatpush.msra.mxu0 %v85_v22  ;;  %s1192_s14 = smov 112   ;;  %s1193_s15 = smov 56  }
  0x19   :  { %959 = vmatpush.msra.mxu3 %v84_v23  ;;  %s1194_s16 = smov 48   ;;  %s1195_s17 = smov 40  }
  0x1a   :  { %v1001_v5 = vpop.eup %1000  ;;  %215 = vmatpush.msra.mxu0 %v84_v23  ;;  %s1196_s18 = smov [#allocation10]   ;;  %s904_s22 = sshll.u32 %s1421_s4, 4  ;;  %s905_s22 = int_to_ptr.hbm [resolvable:$true] %s904_s22 }
  0x1b   :  { %v112_v6 = vmul.f32 32.0, %v1001_v5  ;;  %vm116_vm1 = vweird.f32 %v1001_v5  ;;  %960 = vmatpush.msra.mxu3 %v83_v25  ;;  %s902_s19 = sshll.u32 %s1196_s18, 4  ;;  %s903_s19 = int_to_ptr.vmem [resolvable:$true] %s902_s19 }
  0x1c   :  { %216 = vmatpush.msra.mxu0 %v83_v25 }
  0x1d   :  { %106 = vadd.xlane.f32.xlu0 %v105_v3  ;;  %v113_v7 = vsub.f32 1.0, %v112_v6 }
  0x1f   :  { %v114_v8 = vmul.f32 %v1001_v5, %v113_v7 }
  0x21   :  { %v115_v9 = vadd.f32 %v1001_v5, %v114_v8 }
  0x23   :  { %v1251_v10 = vsel %vm116_vm1, %v1001_v5, %v115_v9 }
  0x88   :  { %v110_v11 = vpop.xlane.xlu0 %109 }
  0x89   :  { %v119_v12 = vmul.f32 %v1251_v10, %v110_v11 }
  0x8b   :  { %v1255_v13 = vsub.f32 %v1243_v0, %v119_v12 }
  0x8d   :  { %v123_v14 = vmul.f32 %v1255_v13, %v1255_v13  ;;  %v158_v61 = vmul.f32 %v156_v55, %v1255_v13 }
  0x8f   :  { %v127_v15 = vsel %vm104_vm0, %v123_v14, 0.0 }
  0x90   :  { %128 = vadd.xlane.f32.xlu1 %v127_v15  ;;  %v107_v16 = vpop.xlane.xlu0 %106 }
  0x91   :  { %v118_v17 = vmul.f32 %v1251_v10, %v107_v16 }
  0x93   :  { %v1262_v18 = vsub.f32 %v1247_v2, %v118_v17 }
  0x95   :  { %v122_v19 = vmul.f32 %v1262_v18, %v1262_v18  ;;  %v157_v14 = vmul.f32 %v156_v55, %v1262_v18 }
  0x97   :  { %v124_v20 = vsel %vm104_vm0, %v122_v19, 0.0 }
  0x98   :  { %125 = vadd.xlane.f32.xlu1 %v124_v20  ;;  %v194_v20 = vperm.slane %v1267_v52, 0 }
 0x103   :  { %v129_v24 = vpop.xlane.xlu1 %128 }
 0x104   :  { %v131_v26 = vmul.f32 0.032258064, %v129_v24 }
 0x106   :  { %1002 = vrsqrt.f32 %v131_v26  ;;  %vm151_vm2 = vcmp.eq.f32.partialorder %v131_v26, inf  ;;  %v154_v39 = vand.u32 2147483648, %v131_v26  ;;  %vm153_vm3 = vcmp.eq.f32.partialorder %v131_v26, 0.0 }
 0x10b   :  { %v126_v27 = vpop.xlane.xlu1 %125 }
 0x10c   :  { %v1003_v28 = vpop.eup %1002  ;;  %v130_v29 = vmul.f32 0.032258064, %v126_v27  ;;  %v1288_v27 = vld [vmem:[#allocation5] sm:$0xff] }
 0x10d   :  { %v145_v30 = vmul.f32 %v1003_v28, %v131_v26 }
 0x10e   :  { %1004 = vrsqrt.f32 %v130_v29  ;;  %vm139_vm4 = vcmp.eq.f32.partialorder %v130_v29, inf  ;;  %v142_v47 = vand.u32 2147483648, %v130_v29  ;;  %vm141_vm5 = vcmp.eq.f32.partialorder %v130_v29, 0.0 }
 0x10f   :  { %v146_v31 = vmul.f32 %v1003_v28, %v145_v30 }
 0x111   :  { %v147_v32 = vmul.f32 0.5, %v146_v31 }
 0x113   :  { %v148_v33 = vsub.f32 1.5, %v147_v32  ;;  %v1292_v32 = vld [vmem:[#allocation5 + $0x8] sm:$0xff] }
 0x114   :  { %v1005_v34 = vpop.eup %1004 }
 0x115   :  { %v149_v35 = vmul.f32 %v1003_v28, %v148_v33  ;;  %v133_v36 = vmul.f32 %v1005_v34, %v130_v29 }
 0x117   :  { %v150_v37 = vmul.f32 %v149_v35, %v131_v26  ;;  %v134_v38 = vmul.f32 %v1005_v34, %v133_v36 }
 0x119   :  { %v135_v40 = vmul.f32 0.5, %v134_v38  ;;  %v152_v41 = vsel %vm151_vm2, %v131_v26, %v150_v37 }
 0x11a   :  { %v155_v42 = vsel %vm153_vm3, %v154_v39, %v152_v41 }
 0x11b   :  { %v136_v43 = vsub.f32 1.5, %v135_v40  ;;  %v160_v44 = vadd.f32 1e-06, %v155_v42  ;;  %v87_v40 = vld [vmem:[#allocation7 + $0x20] sm:$0xff] }
 0x11d   :  { %v137_v45 = vmul.f32 %v1005_v34, %v136_v43  ;;  %1006 = vrcp.f32 %v160_v44  ;;  %v187_v56 = vand.u32 2147483648, %v160_v44  ;;  %v185_v58 = vand.u32 2147483647, %v160_v44 }
 0x11e   :  { %vm181_vm7 = vweird.f32 %v160_v44 }
 0x11f   :  { %v138_v46 = vmul.f32 %v137_v45, %v130_v29  ;;  %v188_v62 = vor.u32 1.1754944e-38, %v187_v56  ;;  %vm186_vm9 = vcmp.eq.f32.partialorder %v185_v58, 8.507059e+37 }
 0x121   :  { %v140_v48 = vsel %vm139_vm4, %v130_v29, %v138_v46 }
 0x122   :  { %v143_v49 = vsel %vm141_vm5, %v142_v47, %v140_v48 }
 0x123   :  { %v1007_v50 = vpop.eup %1006  ;;  %v159_v51 = vadd.f32 1e-06, %v143_v49 }
 0x124   :  { %v177_v53 = vmul.f32 %v1007_v50, %v160_v44  ;;  %vm182_vm6 = vweird.f32 %v1007_v50 }
 0x125   :  { %1008 = vrcp.f32 %v159_v51  ;;  %vm183_vm8 = vmor %vm181_vm7, %vm182_vm6  ;;  %v172_v7 = vand.u32 2147483648, %v159_v51  ;;  %v170_v11 = vand.u32 2147483647, %v159_v51  ;;  %vm166_vm11 = vweird.f32 %v159_v51 }
 0x126   :  { %v178_v54 = vsub.f32 1.0, %v177_v53 }
 0x127   :  { %v173_v13 = vor.u32 1.1754944e-38, %v172_v7  ;;  %vm171_vm13 = vcmp.eq.f32.partialorder %v170_v11, 8.507059e+37 }
 0x128   :  { %v179_v57 = vmul.f32 %v1007_v50, %v178_v54 }
 0x12a   :  { %v180_v59 = vadd.f32 %v1007_v50, %v179_v57 }
 0x12b   :  { %v1009_v60 = vpop.eup %1008 }
 0x12c   :  { %v184_v63 = vsel %vm183_vm8, %v1007_v50, %v180_v59  ;;  %v162_v3 = vmul.f32 %v1009_v60, %v159_v51  ;;  %vm167_vm10 = vweird.f32 %v1009_v60 }
 0x12d   :  { %v189_v4 = vsel %vm186_vm9, %v188_v62, %v184_v63  ;;  %vm168_vm12 = vmor %vm166_vm11, %vm167_vm10 }
 0x12e   :  { %v190_v5 = vmul.f32 %v189_v4, %v158_v61  ;;  %v163_v6 = vsub.f32 1.0, %v162_v3 }
 0x130   :  { %v193_v8 = vadd.f32 %v191_v1, %v190_v5  ;;  %v164_v9 = vmul.f32 %v1009_v60, %v163_v6 }
 0x132   :  { %920 = vmatmul.msk.f32.vlgmr.msra.gmra.mxu3 %vm104_vm0, %v193_v8  ;;  %v165_v12 = vadd.f32 %v1009_v60, %v164_v9 }
 0x134   :  { %v169_v15 = vsel %vm168_vm12, %v1009_v60, %v165_v12 }
 0x135   :  { %v174_v16 = vsel %vm171_vm13, %v173_v13, %v169_v15  ;;  %vm864_vm13 = vcmask 523264  }
 0x136   :  { %v175_v17 = vmul.f32 %v174_v16, %v157_v14 }
 0x138   :  { %v192_v19 = vadd.f32 %v191_v1, %v175_v17 }
 0x13a   :  { %919 = vmatmul.msk.f32.vlgmr.msra.gmra.mxu0 %vm104_vm0, %v192_v19 }
 0x1b5   :  { %v221_v21 = vpop.f32.mrf.mxu3 }
 0x1b6   :  { %v1276_v22 = vadd.f32 %v221_v21, %v194_v20 }
 0x1b7   :  { %v218_v23 = vpop.f32.mrf.mxu0 }
 0x1b8   :  { %228 = vrot.lane.b32.xlu2 %v1276_v22, %s1185_s3  ;;  %v1279_v24 = vadd.f32 %v218_v23, %v194_v20 }
 0x1ba   :  { %v1298_v36 = vpack.i.bf16 %v1279_v24, %v1276_v22 }
 0x1c0   :  { %226 = vrot.lane.b32.xlu2 %v1279_v24, %s1185_s3 }
 0x212   :  { %v229_v18 = vpop.permute.xlu2 %228 }
 0x213   :  { %921 = vmatpush.xpose.msk.msra.mxu1 %vm230_vm14, %v229_v18 }
 0x21a   :  { %v227_v25 = vpop.permute.xlu2 %226 }
 0x21b   :  { %922 = vmatpush.xpose.msk.msra.mxu1 %vm230_vm14, %v227_v25 }
 0x21e   :  { %923 = vmatmul.msk.f32.vlgmr.msra.gmra.mxu1 %vm230_vm14, %v1279_v24 }
 0x21f   :  { %474 = vmatpush.msrb.mxu1 %v87_v40 }
 0x226   :  { %924 = vmatmul.msk.f32.gmra.mxu1 %vm230_vm14, %v1276_v22 }
 0x29b   :  { %v256_v26 = vpop.f32.mrf.mxu1 }
 0x29c   :  { %v262_v28 = vmul.f32 0.35355338, %v256_v26 }
 0x29e   :  { %v264_v29 = vadd.f32 %v262_v28, %v1288_v27 }
 0x2a0   :  { %v267_v30 = vsel %vm266_vm15, %v264_v29, -inf }
 0x2a1   :  { %268 = vmax.xlane.f32.xlu0 %v267_v30 }
 0x2a3   :  { %v259_v31 = vpop.f32.mrf.mxu1 }
 0x2a4   :  { %v263_v33 = vmul.f32 0.35355338, %v259_v31 }
 0x2a6   :  { %v265_v34 = vadd.f32 %v263_v33, %v1292_v32 }
 0x2a8   :  { %v270_v35 = vsel %vm266_vm15, %v265_v34, -inf }
 0x2a9   :  { %271 = vmax.xlane.f32.xlu1 %v270_v35 }
 0x2b5   :  { %981 = vrot.lane.b32.xlu0 %v1298_v36, %s1186_s8 }
 0x2bd   :  { %328 = vrot.lane.b32.xlu0 %v1279_v24, %s1187_s9 }
 0x2c5   :  { %324 = vrot.lane.b32.xlu0 %v1279_v24, %s1188_s10 }
 0x2cd   :  { %619 = vrot.lane.b32.xlu0 %v1276_v22, %s1189_s11 }
 0x2d5   :  { %617 = vrot.lane.b32.xlu0 %v1279_v24, %s1189_s11 }
 0x2dd   :  { %613 = vrot.lane.b32.xlu0 %v1279_v24, %s1190_s12 }
 0x314   :  { %v269_v37 = vpop.xlane.xlu0 %268 }
 0x315   :  { %v273_v38 = vsub.f32 %v264_v29, %v269_v37 }
 0x317   :  { %v275_v39 = vmul.f32 1.442695, %v273_v38 }
 0x319   :  { %1010 = vpow2.f32 %v275_v39 }
 0x31c   :  { %v272_v41 = vpop.xlane.xlu1 %271 }
 0x31d   :  { %v274_v42 = vsub.f32 %v265_v34, %v272_v41 }
 0x31f   :  { %v1011_v43 = vpop.eup %1010  ;;  %v277_v44 = vmul.f32 1.442695, %v274_v42 }
 0x320   :  { %v279_v45 = vsel %vm266_vm15, %v1011_v43, 0.0 }
 0x321   :  { %1012 = vpow2.f32 %v277_v44  ;;  %280 = vadd.xlane.f32.xlu2 %v279_v45 }
 0x327   :  { %v1013_v46 = vpop.eup %1012  ;;  %v982_v47 = vpop.permute.xlu0 %981 }
 0x328   :  { %v282_v48 = vsel %vm266_vm15, %v1013_v46, 0.0  ;;  %v983_v49 = vunpack.i.l.bf16 %v982_v47  ;;  %v984_v50 = vunpack.i.h.bf16 %v982_v47 }
 0x329   :  { %283 = vadd.xlane.f32.xlu1 %v282_v48 }
 0x32a   :  { %315 = vmatpush.msra.mxu2 %v983_v49 }
 0x32c   :  { %316 = vmatpush.msra.mxu2 %v984_v50 }
 0x32f   :  { %v329_v51 = vpop.permute.xlu0 %328 }
 0x337   :  { %v325_v53 = vpop.permute.xlu0 %324 }
 0x339   :  { %488 = vrot.lane.b32.xlu2 %v1276_v22, %s1191_s13 }
 0x33f   :  { %v620_v54 = vpop.permute.xlu0 %619 }
 0x340   :  { %945 = vmatpush.xpose.msk.msra.mxu1 %vm230_vm14, %v620_v54 }
 0x341   :  { %615 = vrot.lane.b32.xlu2 %v1276_v22, %s1190_s12 }
 0x342   :  { %330 = vrot.lane.b32.xlu1 %v1276_v22, %s1187_s9 }
 0x347   :  { %v618_v55 = vpop.permute.xlu0 %617 }
 0x348   :  { %946 = vmatpush.xpose.msk.msra.mxu1 %vm230_vm14, %v618_v55 }
 0x34a   :  { %326 = vrot.lane.b32.xlu1 %v1276_v22, %s1188_s10 }
 0x34f   :  { %v614_v8 = vpop.permute.xlu0 %613 }
 0x352   :  { %486 = vrot.lane.b32.xlu1 %v1279_v24, %s1191_s13 }
 0x35a   :  { %482 = vrot.lane.b32.xlu1 %v1279_v24, %s1192_s14 }
 0x362   :  { %484 = vrot.lane.b32.xlu1 %v1276_v22, %s1192_s14 }
 0x394   :  { %v281_v56 = vpop.xlane.xlu2 %280 }
 0x395   :  { %1014 = vrcp.f32 %v281_v56 }
 0x39b   :  { %v1015_v57 = vpop.eup %1014 }
 0x39c   :  { %v284_v58 = vpop.xlane.xlu1 %283  ;;  %v287_v59 = vmul.f32 %v1015_v57, %v1011_v43  ;;  %v489_v63 = vpop.permute.xlu2 %488 }
 0x39d   :  { %1016 = vrcp.f32 %v284_v58 }
 0x39e   :  { %925 = vmatmul.msk.f32.vlgmr.msra.gmra.mxu2 %vm266_vm15, %v287_v59 }
 0x3a3   :  { %v1017_v60 = vpop.eup %1016 }
 0x3a4   :  { %v288_v61 = vmul.f32 %v1017_v60, %v1013_v46  ;;  %v616_v9 = vpop.permute.xlu2 %615 }
 0x3a6   :  { %926 = vmatmul.msk.f32.gmra.mxu2 %vm266_vm15, %v288_v61 }
 0x3b4   :  { %v331_v62 = vpop.permute.xlu1 %330 }
 0x3b5   :  { %927 = vmatpush.xpose.msk.msrb.mxu3 %vm230_vm14, %v331_v62 }
 0x3b9   :  { %928 = vmatpush.xpose.msk.msrb.mxu3 %vm230_vm14, %v329_v51 }
 0x3bc   :  { %929 = vmatmul.msk.f32.vlgmr.msrb.gmra.mxu3 %vm230_vm14, %v325_v53  ;;  %v327_v1 = vpop.permute.xlu1 %326 }
 0x3bd   :  { %937 = vmatpush.xpose.msk.msra.mxu3 %vm230_vm14, %v489_v63 }
 0x3c4   :  { %930 = vmatmul.msk.f32.gmra.mxu3 %vm230_vm14, %v327_v1  ;;  %v487_v3 = vpop.permute.xlu1 %486 }
 0x3c5   :  { %938 = vmatpush.xpose.msk.msra.mxu3 %vm230_vm14, %v487_v3 }
 0x3cc   :  { %v483_v4 = vpop.permute.xlu1 %482 }
 0x3cd   :  { %939 = vmatmul.msk.f32.vlgmr.msra.gmra.mxu3 %vm230_vm14, %v483_v4 }
 0x3d4   :  { %v485_v5 = vpop.permute.xlu1 %484 }
 0x3d5   :  { %940 = vmatmul.msk.f32.gmra.mxu3 %vm230_vm14, %v485_v5 }
 0x421   :  { %v318_v6 = vpop.f32.mrf.mxu2 }
 0x422   :  { %935 = vmatmul.msk.f32.vlgmr.msrb.gmra.mxu1 %vm230_vm14, %v318_v6 }
 0x429   :  { %v321_v7 = vpop.f32.mrf.mxu2 }
 0x42a   :  { %936 = vmatmul.msk.f32.gmra.mxu1 %vm230_vm14, %v321_v7 }
 0x432   :  { %947 = vmatmul.msk.f32.vlgmr.msra.gmra.mxu1 %vm230_vm14, %v614_v8 }
 0x43a   :  { %948 = vmatmul.msk.f32.gmra.mxu1 %vm230_vm14, %v616_v9 }
 0x43f   :  { %v357_v11 = vpop.f32.mrf.mxu3 }
 0x440   :  { %v363_v12 = vmul.f32 0.35355338, %v357_v11 }
 0x442   :  { %v365_v13 = vadd.f32 %v363_v12, %v1288_v27 }
 0x444   :  { %v367_v14 = vsel %vm266_vm15, %v365_v13, -inf }
 0x445   :  { %368 = vmax.xlane.f32.xlu0 %v367_v14 }
 0x447   :  { %v360_v15 = vpop.f32.mrf.mxu3 }
 0x448   :  { %v364_v16 = vmul.f32 0.35355338, %v360_v15 }
 0x44a   :  { %v366_v17 = vadd.f32 %v364_v16, %v1292_v32 }
 0x44c   :  { %v370_v19 = vsel %vm266_vm15, %v366_v17, -inf }
 0x44d   :  { %371 = vmax.xlane.f32.xlu1 %v370_v19 }
 0x450   :  { %v515_v20 = vpop.f32.mrf.mxu3 }
 0x451   :  { %v521_v21 = vmul.f32 0.35355338, %v515_v20 }
 0x453   :  { %v523_v22 = vadd.f32 %v521_v21, %v1288_v27 }
 0x455   :  { %v525_v23 = vsel %vm266_vm15, %v523_v22, -inf }
 0x456   :  { %526 = vmax.xlane.f32.xlu0 %v525_v23 }
 0x458   :  { %v518_v24 = vpop.f32.mrf.mxu3 }
 0x459   :  { %v522_v18 = vmul.f32 0.35355338, %v518_v24  ;;  %v88_v24 = vld [vmem:[#allocation7 + $0x28] sm:$0xff] }
 0x45a   :  { %445 = vmatpush.msrb.mxu0 %v88_v24 }
 0x45b   :  { %v524_v25 = vadd.f32 %v522_v18, %v1292_v32 }
 0x45d   :  { %v528_v26 = vsel %vm266_vm15, %v524_v25, -inf }
 0x45e   :  { %529 = vmax.xlane.f32.xlu1 %v528_v26  ;;  %v89_v26 = vld [vmem:[#allocation7 + $0x30] sm:$0xff] }
 0x45f   :  { %603 = vmatpush.msra.mxu0 %v89_v26 }
 0x49f   :  { %v1343_v28 = vpop.f32.mrf.mxu1 }
 0x4a7   :  { %v1345_v29 = vpop.f32.mrf.mxu1 }
 0x4af   :  { %v646_v30 = vpop.f32.mrf.mxu1 }
 0x4b0   :  { %v652_v31 = vmul.f32 0.35355338, %v646_v30  ;;  %v90_v30 = vld [vmem:[#allocation7 + $0x38] sm:$0xff] }
 0x4b2   :  { %v654_v33 = vadd.f32 %v652_v31, %v1288_v27 }
 0x4b4   :  { %v656_v34 = vsel %vm266_vm15, %v654_v33, -inf }
 0x4b5   :  { %657 = vmax.xlane.f32.xlu2 %v656_v34 }
 0x4b7   :  { %v649_v35 = vpop.f32.mrf.mxu1 }
 0x4b8   :  { %v653_v37 = vmul.f32 0.35355338, %v649_v35  ;;  %v369_v38 = vpop.xlane.xlu0 %368 }
 0x4b9   :  { %v373_v39 = vsub.f32 %v365_v13, %v369_v38 }
 0x4ba   :  { %v655_v40 = vadd.f32 %v653_v37, %v1292_v32 }
 0x4bb   :  { %v375_v41 = vmul.f32 1.442695, %v373_v39 }
 0x4bc   :  { %v659_v42 = vsel %vm266_vm15, %v655_v40, -inf }
 0x4bd   :  { %1018 = vpow2.f32 %v375_v41  ;;  %660 = vmax.xlane.f32.xlu2 %v659_v42 }
 0x4c0   :  { %v372_v43 = vpop.xlane.xlu1 %371 }
 0x4c1   :  { %v374_v44 = vsub.f32 %v366_v17, %v372_v43 }
 0x4c3   :  { %v1019_v45 = vpop.eup %1018  ;;  %v377_v46 = vmul.f32 1.442695, %v374_v44 }
 0x4c4   :  { %v379_v27 = vsel %vm266_vm15, %v1019_v45, 0.0 }
 0x4c5   :  { %1020 = vpow2.f32 %v377_v46  ;;  %380 = vadd.xlane.f32.xlu0 %v379_v27 }
 0x4c9   :  { %v527_v47 = vpop.xlane.xlu0 %526 }
 0x4ca   :  { %v531_v48 = vsub.f32 %v523_v22, %v527_v47 }
 0x4cb   :  { %v1021_v49 = vpop.eup %1020 }
 0x4cc   :  { %v533_v50 = vmul.f32 1.442695, %v531_v48  ;;  %v382_v51 = vsel %vm266_vm15, %v1021_v49, 0.0 }
 0x4cd   :  { %383 = vadd.xlane.f32.xlu1 %v382_v51 }
 0x4ce   :  { %1022 = vpow2.f32 %v533_v50 }
 0x4d1   :  { %v530_v57 = vpop.xlane.xlu1 %529 }
 0x4d2   :  { %v532_v61 = vsub.f32 %v524_v25, %v530_v57 }
 0x4d4   :  { %v1023_v32 = vpop.eup %1022  ;;  %v535_v1 = vmul.f32 1.442695, %v532_v61 }
 0x4d5   :  { %986 = vrot.lane.b32.xlu2 %v1298_v36, %s1193_s15  ;;  %v537_v53 = vsel %vm266_vm15, %v1023_v32, 0.0 }
 0x4d6   :  { %538 = vadd.xlane.f32.xlu1 %v537_v53 }
 0x4dd   :  { %996 = vrot.lane.b32.xlu2 %v1298_v36, %s1194_s16 }
 0x528   :  { %v658_v54 = vpop.xlane.xlu2 %657 }
 0x529   :  { %v662_v55 = vsub.f32 %v654_v33, %v658_v54  ;;  %v746_v54 = vperm.slane %v1267_v52, 2 }
 0x52b   :  { %v664_v56 = vmul.f32 1.442695, %v662_v55 }
 0x52d   :  { %1024 = vpow2.f32 %v664_v56 }
 0x530   :  { %v661_v58 = vpop.xlane.xlu2 %660 }
 0x531   :  { %v663_v59 = vsub.f32 %v655_v40, %v661_v58 }
 0x533   :  { %v1025_v60 = vpop.eup %1024  ;;  %v666_v62 = vmul.f32 1.442695, %v663_v59 }
 0x534   :  { %v668_v63 = vsel %vm266_vm15, %v1025_v60, 0.0 }
 0x535   :  { %1026 = vpow2.f32 %v666_v62  ;;  %669 = vadd.xlane.f32.xlu0 %v668_v63 }
 0x538   :  { %v987_v3 = vpop.permute.xlu2 %986  ;;  %v381_v4 = vpop.xlane.xlu0 %380 }
 0x539   :  { %1028 = vrcp.f32 %v381_v4  ;;  %v988_v5 = vunpack.i.l.bf16 %v987_v3  ;;  %v989_v7 = vunpack.i.h.bf16 %v987_v3 }
 0x53a   :  { %1030 = vpow2.f32 %v535_v1 }
 0x53b   :  { %v1027_v6 = vpop.eup %1026  ;;  %415 = vmatpush.msrb.mxu2 %v988_v5 }
 0x53c   :  { %v671_v8 = vsel %vm266_vm15, %v1027_v6, 0.0 }
 0x53d   :  { %416 = vmatpush.msrb.mxu2 %v989_v7  ;;  %672 = vadd.xlane.f32.xlu1 %v671_v8 }
 0x53f   :  { %v1029_v9 = vpop.eup %1028 }
 0x540   :  { %v997_v11 = vpop.permute.xlu2 %996  ;;  %v384_v12 = vpop.xlane.xlu1 %383  ;;  %v387_v13 = vmul.f32 %v1029_v9, %v1019_v45 }
 0x541   :  { %v1031_v14 = vpop.eup %1030  ;;  %v998_v15 = vunpack.i.l.bf16 %v997_v11  ;;  %1032 = vrcp.f32 %v384_v12  ;;  %v999_v16 = vunpack.i.h.bf16 %v997_v11  ;;  %v94_v11 = vld [vmem:[#allocation7 + $0x58] sm:$0xff]  ;;  %v93_v12 = vld [vmem:[#allocation7 + $0x50] sm:$0xff] }
 0x542   :  { %931 = vmatmul.msk.f32.vlgmr.msrb.gmra.mxu2 %vm266_vm15, %v387_v13  ;;  %v540_v17 = vsel %vm266_vm15, %v1031_v14, 0.0 }
 0x543   :  { %573 = vmatpush.msra.mxu2 %v998_v15 }
 0x545   :  { %574 = vmatpush.msra.mxu2 %v999_v16  ;;  %541 = vadd.xlane.f32.xlu1 %v540_v17  ;;  %v91_v16 = vld [vmem:[#allocation7 + $0x40] sm:$0xff] }
 0x547   :  { %v1033_v19 = vpop.eup %1032  ;;  %734 = vmatpush.msrb.mxu2 %v90_v30 }
 0x548   :  { %v388_v20 = vmul.f32 %v1033_v19, %v1021_v49 }
 0x549   :  { %991 = vrot.lane.b32.xlu0 %v1298_v36, %s1195_s17  ;;  %v539_v21 = vpop.xlane.xlu1 %538 }
 0x54a   :  { %1034 = vrcp.f32 %v539_v21  ;;  %932 = vmatmul.msk.f32.gmra.mxu2 %vm266_vm15, %v388_v20 }
 0x550   :  { %v1035_v22 = vpop.eup %1034 }
 0x551   :  { %v545_v23 = vmul.f32 %v1035_v22, %v1023_v32 }
 0x553   :  { %941 = vmatmul.msk.f32.vlgmr.msra.gmra.mxu2 %vm266_vm15, %v545_v23 }
 0x5a8   :  { %v670_v25 = vpop.xlane.xlu0 %669 }
 0x5a9   :  { %1036 = vrcp.f32 %v670_v25 }
 0x5af   :  { %v1037_v33 = vpop.eup %1036 }
 0x5b0   :  { %v673_v18 = vpop.xlane.xlu1 %672  ;;  %v676_v38 = vmul.f32 %v1037_v33, %v1025_v60 }
 0x5b8   :  { %v542_v31 = vpop.xlane.xlu1 %541 }
 0x5b9   :  { %1038 = vrcp.f32 %v542_v31 }
 0x5ba   :  { %1040 = vrcp.f32 %v673_v18 }
 0x5bb   :  { %v992_v36 = vpop.permute.xlu0 %991 }
 0x5bc   :  { %v993_v34 = vunpack.i.l.bf16 %v992_v36  ;;  %v994_v35 = vunpack.i.h.bf16 %v992_v36 }
 0x5be   :  { %704 = vmatpush.msrb.mxu3 %v993_v34 }
 0x5bf   :  { %v1039_v37 = vpop.eup %1038 }
 0x5c0   :  { %705 = vmatpush.msrb.mxu3 %v994_v35  ;;  %v546_v39 = vmul.f32 %v1039_v37, %v1031_v14  ;;  %v1041_v40 = vpop.eup %1040  ;;  %v92_v14 = vld [vmem:[#allocation7 + $0x48] sm:$0xff]  ;;  %v102_v35 = vld [vmem:[#allocation7 + $0x98] sm:$0xff]  ;;  %v101_v37 = vld [vmem:[#allocation7 + $0x90] sm:$0xff] }
 0x5c1   :  { %949 = vmatmul.msk.f32.vlgmr.msrb.gmra.mxu3 %vm266_vm15, %v676_v38  ;;  %v677_v42 = vmul.f32 %v1041_v40, %v1027_v6  ;;  %879 = vmatpush.msrb.mxu1 %v102_v35  ;;  %v100_v40 = vld [vmem:[#allocation7 + $0x88] sm:$0xff] }
 0x5c2   :  { %942 = vmatmul.msk.f32.gmra.mxu2 %vm266_vm15, %v546_v39 }
 0x5c3   :  { %880 = vmatpush.msrb.mxu1 %v101_v37 }
 0x5c5   :  { %v418_v41 = vpop.f32.mrf.mxu2  ;;  %881 = vmatpush.msrb.mxu1 %v100_v40 }
 0x5c6   :  { %933 = vmatmul.msk.f32.vlgmr.msrb.gmra.mxu0 %vm230_vm14, %v418_v41 }
 0x5c7   :  { %850 = vmatpush.msrb.mxu0 %v94_v11 }
 0x5c9   :  { %950 = vmatmul.msk.f32.gmra.mxu3 %vm266_vm15, %v677_v42  ;;  %851 = vmatpush.msrb.mxu0 %v93_v12  ;;  %v99_v42 = vld [vmem:[#allocation7 + $0x80] sm:$0xff] }
 0x5ca   :  { %882 = vmatpush.msrb.mxu1 %v99_v42 }
 0x5cb   :  { %852 = vmatpush.msrb.mxu0 %v92_v14  ;;  %v97_v14 = vld [vmem:[#allocation7 + $0x70] sm:$0xff] }
 0x5cd   :  { %v421_v43 = vpop.f32.mrf.mxu2  ;;  %853 = vmatpush.msrb.mxu0 %v91_v16  ;;  %v95_v16 = vld [vmem:[#allocation7 + $0x60] sm:$0xff] }
 0x5ce   :  { %934 = vmatmul.msk.f32.gmra.mxu0 %vm230_vm14, %v421_v43 }
 0x5d6   :  { %v576_v44 = vpop.f32.mrf.mxu2 }
 0x5d7   :  { %943 = vmatmul.msk.f32.vlgmr.msra.gmra.mxu0 %vm230_vm14, %v576_v44 }
 0x643   :  { %v447_v47 = vpop.f32.mrf.mxu0 }
 0x644   :  { %v707_v45 = vpop.f32.mrf.mxu3  ;;  %v477_v50 = vadd.f32 %v1343_v28, %v447_v47 }
 0x645   :  { %v579_v46 = vpop.f32.mrf.mxu2  ;;  %951 = vmatmul.msk.f32.vlgmr.msrb.gmra.mxu2 %vm230_vm14, %v707_v45  ;;  %v98_v45 = vld [vmem:[#allocation7 + $0x78] sm:$0xff] }
 0x646   :  { %944 = vmatmul.msk.f32.gmra.mxu0 %vm230_vm14, %v579_v46  ;;  %883 = vmatpush.msrb.mxu1 %v98_v45 }
 0x648   :  { %884 = vmatpush.msrb.mxu1 %v97_v14 }
 0x64b   :  { %v450_v48 = vpop.f32.mrf.mxu0 }
 0x64c   :  { %v710_v27 = vpop.f32.mrf.mxu3  ;;  %v480_v57 = vadd.f32 %v1345_v29, %v450_v48 }
 0x64d   :  { %952 = vmatmul.msk.f32.gmra.mxu2 %vm230_vm14, %v710_v27 }
 0x654   :  { %v605_v49 = vpop.f32.mrf.mxu0 }
 0x655   :  { %v611_v51 = vadd.f32 %v605_v49, %v477_v50 }
 0x6c3   :  { %v608_v56 = vpop.f32.mrf.mxu0 }
 0x6c4   :  { %v612_v59 = vadd.f32 %v608_v56, %v480_v57 }
 0x6c8   :  { %v736_v32 = vpop.f32.mrf.mxu2 }
 0x6c9   :  { %v742_v53 = vadd.f32 %v736_v32, %v611_v51  ;;  %v793_v51 = vperm.slane %v1267_v52, 6 }
 0x6cb   :  { %v744_v55 = vadd.f32 %v742_v53, %v1247_v2 }
 0x6cd   :  { %v1376_v58 = vadd.f32 %v746_v54, %v744_v55 }
 0x6cf   :  { %v749_v60 = vsel %vm104_vm0, %v1376_v58, 0.0 }
 0x6d0   :  { %750 = vadd.xlane.f32.xlu0 %v749_v60  ;;  %v739_v61 = vpop.f32.mrf.mxu2 }
 0x6d1   :  { %v743_v62 = vadd.f32 %v739_v61, %v612_v59  ;;  %v828_v61 = vperm.slane %v1267_v52, 7 }
 0x6d3   :  { %v745_v28 = vadd.f32 %v743_v62, %v1243_v0 }
 0x6d5   :  { %v1381_v63 = vadd.f32 %v746_v54, %v745_v28 }
 0x6d7   :  { %v752_v1 = vsel %vm104_vm0, %v1381_v63, 0.0 }
 0x6d8   :  { %753 = vadd.xlane.f32.xlu2 %v752_v1 }
 0x743   :  { %v751_v2 = vpop.xlane.xlu0 %750 }
 0x744   :  { %v755_v29 = vmul.f32 %v751_v2, %v1251_v10 }
 0x746   :  { %v1387_v3 = vsub.f32 %v1376_v58, %v755_v29 }
 0x748   :  { %v759_v4 = vmul.f32 %v1387_v3, %v1387_v3  ;;  %v794_v57 = vmul.f32 %v793_v51, %v1387_v3 }
 0x74a   :  { %v761_v5 = vsel %vm104_vm0, %v759_v4, 0.0 }
 0x74b   :  { %762 = vadd.xlane.f32.xlu1 %v761_v5  ;;  %v754_v6 = vpop.xlane.xlu2 %753 }
 0x74c   :  { %v756_v0 = vmul.f32 %v754_v6, %v1251_v10 }
 0x74e   :  { %v1394_v7 = vsub.f32 %v1381_v63, %v756_v0 }
 0x750   :  { %v760_v8 = vmul.f32 %v1394_v7, %v1394_v7 }
 0x752   :  { %v764_v9 = vsel %vm104_vm0, %v760_v8, 0.0  ;;  %v795_v8 = vmul.f32 %v793_v51, %v1394_v7 }
 0x753   :  { %765 = vadd.xlane.f32.xlu1 %v764_v9 }
 0x7be   :  { %v763_v13 = vpop.xlane.xlu1 %762 }
 0x7bf   :  { %v767_v15 = vmul.f32 0.032258064, %v763_v13 }
 0x7c1   :  { %1042 = vrsqrt.f32 %v767_v15  ;;  %vm776_vm1 = vcmp.eq.f32.partialorder %v767_v15, inf  ;;  %v779_v31 = vand.u32 2147483648, %v767_v15  ;;  %vm778_vm2 = vcmp.eq.f32.partialorder %v767_v15, 0.0 }
 0x7c6   :  { %v766_v10 = vpop.xlane.xlu1 %765 }
 0x7c7   :  { %v1043_v17 = vpop.eup %1042  ;;  %v768_v19 = vmul.f32 0.032258064, %v766_v10  ;;  %v831_v10 = vperm.slane %v1267_v52, 1 }
 0x7c8   :  { %v770_v20 = vmul.f32 %v1043_v17, %v767_v15 }
 0x7c9   :  { %1044 = vrsqrt.f32 %v768_v19  ;;  %vm788_vm3 = vcmp.eq.f32.partialorder %v768_v19, inf  ;;  %v791_v44 = vand.u32 2147483648, %v768_v19  ;;  %vm790_vm4 = vcmp.eq.f32.partialorder %v768_v19, 0.0 }
 0x7ca   :  { %v771_v21 = vmul.f32 %v1043_v17, %v770_v20 }
 0x7cc   :  { %v772_v22 = vmul.f32 0.5, %v771_v21 }
 0x7ce   :  { %v773_v23 = vsub.f32 1.5, %v772_v22 }
 0x7cf   :  { %v1045_v24 = vpop.eup %1044 }
 0x7d0   :  { %v774_v18 = vmul.f32 %v1043_v17, %v773_v23  ;;  %v782_v25 = vmul.f32 %v1045_v24, %v768_v19  ;;  %v863_v23 = vperm.slane %v1267_v52, 5 }
 0x7d2   :  { %v775_v26 = vmul.f32 %v774_v18, %v767_v15  ;;  %v783_v30 = vmul.f32 %v1045_v24, %v782_v25 }
 0x7d4   :  { %v777_v36 = vsel %vm776_vm1, %v767_v15, %v775_v26  ;;  %v784_v33 = vmul.f32 0.5, %v783_v30  ;;  %v96_v15 = vld [vmem:[#allocation7 + $0x68] sm:$0xff] }
 0x7d5   :  { %v780_v34 = vsel %vm778_vm2, %v779_v31, %v777_v36  ;;  %885 = vmatpush.msrb.mxu1 %v96_v15 }
 0x7d6   :  { %v796_v38 = vadd.f32 1e-06, %v780_v34  ;;  %v785_v39 = vsub.f32 1.5, %v784_v33 }
 0x7d7   :  { %886 = vmatpush.msrb.mxu1 %v95_v16 }
 0x7d8   :  { %1046 = vrcp.f32 %v796_v38  ;;  %v786_v41 = vmul.f32 %v1045_v24, %v785_v39  ;;  %v809_v32 = vand.u32 2147483648, %v796_v38  ;;  %v807_v54 = vand.u32 2147483647, %v796_v38 }
 0x7d9   :  { %vm803_vm6 = vweird.f32 %v796_v38 }
 0x7da   :  { %v787_v43 = vmul.f32 %v786_v41, %v768_v19  ;;  %v810_v59 = vor.u32 1.1754944e-38, %v809_v32  ;;  %vm808_vm8 = vcmp.eq.f32.partialorder %v807_v54, 8.507059e+37 }
 0x7dc   :  { %v789_v46 = vsel %vm788_vm3, %v768_v19, %v787_v43 }
 0x7dd   :  { %v792_v27 = vsel %vm790_vm4, %v791_v44, %v789_v46 }
 0x7de   :  { %v1047_v47 = vpop.eup %1046  ;;  %v797_v48 = vadd.f32 1e-06, %v792_v27 }
 0x7df   :  { %v799_v49 = vmul.f32 %v1047_v47, %v796_v38  ;;  %vm804_vm5 = vweird.f32 %v1047_v47 }
 0x7e0   :  { %1048 = vrcp.f32 %v797_v48  ;;  %vm805_vm7 = vmor %vm803_vm6, %vm804_vm5  ;;  %v824_v29 = vand.u32 2147483648, %v797_v48  ;;  %v822_v6 = vand.u32 2147483647, %v797_v48  ;;  %vm818_vm10 = vweird.f32 %v797_v48 }
 0x7e1   :  { %v800_v50 = vsub.f32 1.0, %v799_v49 }
 0x7e2   :  { %v825_v3 = vor.u32 1.1754944e-38, %v824_v29  ;;  %vm823_vm12 = vcmp.eq.f32.partialorder %v822_v6, 8.507059e+37 }
 0x7e3   :  { %v801_v53 = vmul.f32 %v1047_v47, %v800_v50 }
 0x7e5   :  { %v802_v55 = vadd.f32 %v1047_v47, %v801_v53 }
 0x7e6   :  { %v1049_v56 = vpop.eup %1048 }
 0x7e7   :  { %v806_v60 = vsel %vm805_vm7, %v1047_v47, %v802_v55  ;;  %v814_v62 = vmul.f32 %v1049_v56, %v797_v48  ;;  %vm819_vm9 = vweird.f32 %v1049_v56 }
 0x7e8   :  { %v811_v28 = vsel %vm808_vm8, %v810_v59, %v806_v60  ;;  %vm820_vm11 = vmor %vm818_vm10, %vm819_vm9 }
 0x7e9   :  { %v812_v1 = vmul.f32 %v811_v28, %v794_v57  ;;  %v815_v2 = vsub.f32 1.0, %v814_v62 }
 0x7eb   :  { %v829_v4 = vadd.f32 %v828_v61, %v812_v1  ;;  %v816_v5 = vmul.f32 %v1049_v56, %v815_v2 }
 0x7ed   :  { %953 = vmatmul.msk.f32.vlgmr.msrb.gmra.mxu0 %vm104_vm0, %v829_v4  ;;  %v817_v0 = vadd.f32 %v1049_v56, %v816_v5 }
 0x7ef   :  { %v821_v9 = vsel %vm820_vm11, %v1049_v56, %v817_v0 }
 0x7f0   :  { %v826_v11 = vsel %vm823_vm12, %v825_v3, %v821_v9 }
 0x7f1   :  { %v827_v12 = vmul.f32 %v826_v11, %v795_v8 }
 0x7f3   :  { %v830_v13 = vadd.f32 %v828_v61, %v827_v12 }
 0x7f5   :  { %954 = vmatmul.msk.f32.gmra.mxu0 %vm104_vm0, %v830_v13 }
 0x86a   :  { %v855_v17 = vpop.f32.mrf.mxu0 }
 0x86b   :  { %v856_v19 = vadd.f32 %v855_v17, %v831_v10 }
 0x86d   :  { %v861_v20 = vmax.f32 %v856_v19, 0.0 }
 0x86f   :  { %955 = vmatmul.msk.f32.vlgmr.msrb.gmra.mxu1 %vm864_vm13, %v861_v20 }
 0x872   :  { %v858_v7 = vpop.f32.mrf.mxu0 }
 0x873   :  { %v859_v21 = vadd.f32 %v858_v7, %v831_v10 }
 0x875   :  { %v862_v22 = vmax.f32 %v859_v21, 0.0 }
 0x877   :  { %956 = vmatmul.msk.f32.gmra.mxu1 %vm864_vm13, %v862_v22 }
 0x8ec   :  { %v888_v24 = vpop.f32.mrf.mxu1 }
 0x8ed   :  { %v889_v18 = vadd.f32 %v888_v24, %v863_v23 }
 0x8ef   :  { %v894_v25 = vadd.f32 %v889_v18, %v1376_v58 }
 0x8f1   :  { %896 = vst.msk [vmem:[#allocation10] sm:$0xff] %vm104_vm0, %v894_v25 }
 0x8f4   :  { %v891_v26 = vpop.f32.mrf.mxu1 }
 0x8f5   :  { %v892_v30 = vadd.f32 %v891_v26, %v863_v23 }
 0x8f7   :  { %v895_v31 = vadd.f32 %v892_v30, %v1381_v63 }
 0x8f9   :  { %897 = vst.msk [vmem:[#allocation10 + $0x8] sm:$0xff] %vm104_vm0, %v895_v31 }
 0x8fa   :  { %910 = dma.vmem_to_hbm [thread:$0]  %s903_s19, 256, %s905_s22, [#allocation4], %s1179_s23, %s1179_s23, %s1180_s24  }
 0x8fb   :  { %1176 = dma.done.wait [#allocation4], 256  }
 0x8fc   :  { %1177 = vsyncadd [#allocation4], 4294967040 }
 0x8fd   :  { %915 = vsyncpa [#allocation3], 1 }
 0x8fe   :  { %916 = vsyncpa [#allocation6], 1 }
 0x8ff   :  { %917 = vsyncpa [#allocation9], 1 }
 0x900   :  { %918 = vsyncpa [#allocation4], 1 }

</bundles_post_ra>
